<compile_context>
chip_gen: v5e
topology: v5e:2x2
jax: 0.10.0
libtpu: 0.0.40
codegen_flags: <defaults>
</compile_context>

<pallas_src>
import functools

import jax
import jax.numpy as jnp
from jax.experimental import pallas as pl
from jax.experimental.pallas import tpu as pltpu

_LANE = 128
_SUBLANE = 8


def _round_up(x, m):
    return ((x + m - 1) // m) * m


def _fused_mlp_kernel(x_ref, *rest, num_layers):
    """Fused MLP over one M tile; weights resident in VMEM.

    x_ref : [TM, K0p]            activation tile (bf16, zero-padded features)
    rest  : w0, b0, ..., w_{L-1}, b_{L-1}, out
            w_i : [K_ip, N_ip]   pre-transposed (x @ W) weights, bf16
            b_i : [1,   N_ip]    bias, f32
            out : [TM, N_lastp]  output tile, f32 (lane-dense, padded N)
    """
    out_ref = rest[-1]
    wb = rest[:-1]

    h = x_ref[...]                          # bf16 [TM, K0p]
    for i in range(num_layers):
        w = wb[2 * i][...]                  # bf16 [K, N]
        b = wb[2 * i + 1][...]              # f32  [1, N]
        # bf16 operands, f32 accumulation on the MXU.
        y = jnp.dot(h, w, preferred_element_type=jnp.float32)
        y = y + b                           # f32 epilogue on the VPU
        if i < num_layers - 1:
            y = jnp.maximum(y, 0.0)
            h = y.astype(jnp.bfloat16)      # single cast feeding next matmul
        else:
            out_ref[...] = y.astype(out_ref.dtype)


def mlp_forward(x, params, *, tm=256):
    """Apply the MLP (ReLU after every layer except the last) in one kernel."""
    orig_shape = x.shape
    in_dim = orig_shape[-1]
    num_layers = len(params)
    n_out = params[-1][0].shape[0]

    # Per-layer feature dims, lane-padded to multiples of 128.
    dims = [in_dim] + [w.shape[0] for (w, _) in params]
    dims_p = [_round_up(d, _LANE) for d in dims]

    # Flatten tokens, cast to bf16, pad M / K0 (zero padding keeps math exact).
    x2d = x.reshape(-1, in_dim).astype(jnp.bfloat16)
    m = x2d.shape[0]
    m_pad = _round_up(m, _SUBLANE)
    tm = min(tm, m_pad)
    m_pad = _round_up(m_pad, tm)
    x2d = jnp.pad(x2d, ((0, m_pad - m), (0, dims_p[0] - in_dim)))

    # Pre-transpose + pad weights to [K_pad, N_pad] (bf16); pad biases (f32).
    wb_inputs = []
    in_specs = [pl.BlockSpec((tm, dims_p[0]), lambda i: (i, 0))]
    for li, (w, b) in enumerate(params):
        n, k = w.shape
        kp, np_ = dims_p[li], dims_p[li + 1]
        w_kn = jnp.pad(w.T.astype(jnp.float32), ((0, kp - k), (0, np_ - n)))
        wb_inputs.append(w_kn.astype(jnp.bfloat16))
        wb_inputs.append(
            jnp.pad(b.astype(jnp.float32), (0, np_ - n)).reshape(1, np_))
        # Weights/biases resident across all M tiles (block index fixed at 0).
        in_specs.append(pl.BlockSpec((kp, np_), lambda i: (0, 0)))
        in_specs.append(pl.BlockSpec((1, np_), lambda i: (0, 0)))

    n_out_p = dims_p[-1]
    grid = (m_pad // tm,)

    # Advisory cost estimate so XLA can schedule around the custom call.
    flops = sum(2 * m_pad * dims_p[i] * dims_p[i + 1]
                for i in range(num_layers))
    bytes_accessed = (
        x2d.size * x2d.dtype.itemsize
        + sum(a.size * a.dtype.itemsize for a in wb_inputs)
        + m_pad * n_out_p * 4
    )

    # VMEM budget (per grid step): 2x double-buffered (TM*K0p bf16 + TM*Np f32)
    # tiles + resident weights; at TM=256 and DETR-sized dims this is well
    # under the 32 MiB scoped default even on v7x (64 MiB physical).
    kernel = functools.partial(_fused_mlp_kernel, num_layers=num_layers)
    out = pl.pallas_call(
        kernel,
        out_shape=jax.ShapeDtypeStruct((m_pad, n_out_p), jnp.float32),
        grid_spec=pltpu.PrefetchScalarGridSpec(
            num_scalar_prefetch=0,
            grid=grid,
            in_specs=in_specs,
            out_specs=pl.BlockSpec((tm, n_out_p), lambda i: (i, 0)),
        ),
        compiler_params=pltpu.CompilerParams(
            dimension_semantics=("parallel",),
        ),
        cost_estimate=pl.CostEstimate(
            flops=flops, transcendentals=0, bytes_accessed=bytes_accessed),
    )(x2d, *wb_inputs)

    out = out[:m, :n_out]
    return out.reshape(orig_shape[:-1] + (n_out,))


def init_mlp_params(key, input_dim, hidden_dim, output_dim, num_layers):
    """Deterministic init matching nn.Linear shapes (W: [out, in], b: [out])."""
    h = [hidden_dim] * (num_layers - 1)
    dims_in = [input_dim] + h
    dims_out = h + [output_dim]
    params = []
    for n_in, n_out in zip(dims_in, dims_out):
        key, kw, kb = jax.random.split(key, 3)
        bound = 1.0 / jnp.sqrt(jnp.float32(n_in))
        w = jax.random.uniform(kw, (n_out, n_in), jnp.float32, -bound, bound)
        b = jax.random.uniform(kb, (n_out,), jnp.float32, -bound, bound)
        params.append((w, b))
    return params


def mlp_reference(x, params):
    """Pure-JAX f32 reference for correctness checking."""
    num_layers = len(params)
    y = x.astype(jnp.float32)
    for i, (w, b) in enumerate(params):
        y = y @ w.T + b
        if i < num_layers - 1:
            y = jnp.maximum(y, 0.0)
    return y


if __name__ == "__main__":
    key = jax.random.PRNGKey(0)
    key, kx = jax.random.split(key)

    # Small DETR-like shapes: (batch, num_queries, input_dim)
    batch, seq = 2, 8
    input_dim, hidden_dim, output_dim, num_layers = 32, 64, 4, 3

    x = jax.random.normal(kx, (batch, seq, input_dim), jnp.float32)
    params = init_mlp_params(key, input_dim, hidden_dim, output_dim, num_layers)

    out = mlp_forward(x, params)
    out = jax.block_until_ready(out)

    ref = mlp_reference(x, params)
    assert out.shape == (batch, seq, output_dim), out.shape
    # bf16 matmul operands with f32 accumulation -> ~1e-2 relative tolerance.
    assert jnp.allclose(out, ref, atol=2e-2, rtol=2e-2), (
        float(jnp.max(jnp.abs(out - ref)))
    )

    print("KERNEL_OK")
</pallas_src>

<mosaic_0001>
module attributes {stable_mosaic.version = 11 : i64} {
  func.func @_fused_mlp_kernel(%arg0: i32, %arg1: memref<16x128xbf16, #tpu.memory_space<vmem>>, %arg2: memref<128x128xbf16, #tpu.memory_space<vmem>>, %arg3: memref<1x128xf32, #tpu.memory_space<vmem>>, %arg4: memref<128x128xbf16, #tpu.memory_space<vmem>>, %arg5: memref<1x128xf32, #tpu.memory_space<vmem>>, %arg6: memref<128x128xbf16, #tpu.memory_space<vmem>>, %arg7: memref<1x128xf32, #tpu.memory_space<vmem>>, %arg8: memref<16x128xf32, #tpu.memory_space<vmem>>) attributes {dimension_semantics = [#tpu.dimension_semantics<parallel>], iteration_bounds = array<i64: 1>, scalar_prefetch = 0 : i64, scratch_operands = 0 : i64, tpu.core_type = #tpu.core_type<tc>, window_params = [{transform_indices = @transform_0, window_bounds = array<i64: 16, 128>}, {pipeline_mode = #tpu.pipeline_mode<synchronous>, transform_indices = @transform_1, window_bounds = array<i64: 128, 128>}, {pipeline_mode = #tpu.pipeline_mode<synchronous>, transform_indices = @transform_2, window_bounds = array<i64: 1, 128>}, {pipeline_mode = #tpu.pipeline_mode<synchronous>, transform_indices = @transform_3, window_bounds = array<i64: 128, 128>}, {pipeline_mode = #tpu.pipeline_mode<synchronous>, transform_indices = @transform_4, window_bounds = array<i64: 1, 128>}, {pipeline_mode = #tpu.pipeline_mode<synchronous>, transform_indices = @transform_5, window_bounds = array<i64: 128, 128>}, {pipeline_mode = #tpu.pipeline_mode<synchronous>, transform_indices = @transform_6, window_bounds = array<i64: 1, 128>}, {transform_indices = @transform_7, window_bounds = array<i64: 16, 128>}]} {
    %c0 = arith.constant 0 : index
    %c0_0 = arith.constant 0 : index
    %0 = vector.load %arg1[%c0, %c0_0] : memref<16x128xbf16, #tpu.memory_space<vmem>>, vector<16x128xbf16>
    %c0_1 = arith.constant 0 : index
    %c0_2 = arith.constant 0 : index
    %1 = vector.load %arg2[%c0_1, %c0_2] : memref<128x128xbf16, #tpu.memory_space<vmem>>, vector<128x128xbf16>
    %c0_3 = arith.constant 0 : index
    %c0_4 = arith.constant 0 : index
    %2 = vector.load %arg3[%c0_3, %c0_4] : memref<1x128xf32, #tpu.memory_space<vmem>>, vector<1x128xf32>
    %cst = arith.constant dense<0.000000e+00> : vector<16x128xf32>
    %3 = tpu.matmul %0, %1, %cst {dimension_numbers = #tpu.dot_dimension_numbers<[1], [0], [0], [1], [0, 0, 1, 1], [], []>} : vector<16x128xbf16>, vector<128x128xbf16>, vector<16x128xf32> -> vector<16x128xf32>
    %4 = vector.broadcast %2 : vector<1x128xf32> to vector<16x128xf32>
    %5 = arith.addf %3, %4 : vector<16x128xf32>
    %cst_5 = arith.constant 0.000000e+00 : f32
    %6 = vector.broadcast %cst_5 : f32 to vector<16x128xf32>
    %7 = arith.maximumf %5, %6 : vector<16x128xf32>
    %8 = arith.truncf %7 : vector<16x128xf32> to vector<16x128xbf16>
    %c0_6 = arith.constant 0 : index
    %c0_7 = arith.constant 0 : index
    %9 = vector.load %arg4[%c0_6, %c0_7] : memref<128x128xbf16, #tpu.memory_space<vmem>>, vector<128x128xbf16>
    %c0_8 = arith.constant 0 : index
    %c0_9 = arith.constant 0 : index
    %10 = vector.load %arg5[%c0_8, %c0_9] : memref<1x128xf32, #tpu.memory_space<vmem>>, vector<1x128xf32>
    %cst_10 = arith.constant dense<0.000000e+00> : vector<16x128xf32>
    %11 = tpu.matmul %8, %9, %cst_10 {dimension_numbers = #tpu.dot_dimension_numbers<[1], [0], [0], [1], [0, 0, 1, 1], [], []>} : vector<16x128xbf16>, vector<128x128xbf16>, vector<16x128xf32> -> vector<16x128xf32>
    %12 = vector.broadcast %10 : vector<1x128xf32> to vector<16x128xf32>
    %13 = arith.addf %11, %12 : vector<16x128xf32>
    %cst_11 = arith.constant 0.000000e+00 : f32
    %14 = vector.broadcast %cst_11 : f32 to vector<16x128xf32>
    %15 = arith.maximumf %13, %14 : vector<16x128xf32>
    %16 = arith.truncf %15 : vector<16x128xf32> to vector<16x128xbf16>
    %c0_12 = arith.constant 0 : index
    %c0_13 = arith.constant 0 : index
    %17 = vector.load %arg6[%c0_12, %c0_13] : memref<128x128xbf16, #tpu.memory_space<vmem>>, vector<128x128xbf16>
    %c0_14 = arith.constant 0 : index
    %c0_15 = arith.constant 0 : index
    %18 = vector.load %arg7[%c0_14, %c0_15] : memref<1x128xf32, #tpu.memory_space<vmem>>, vector<1x128xf32>
    %cst_16 = arith.constant dense<0.000000e+00> : vector<16x128xf32>
    %19 = tpu.matmul %16, %17, %cst_16 {dimension_numbers = #tpu.dot_dimension_numbers<[1], [0], [0], [1], [0, 0, 1, 1], [], []>} : vector<16x128xbf16>, vector<128x128xbf16>, vector<16x128xf32> -> vector<16x128xf32>
    %20 = vector.broadcast %18 : vector<1x128xf32> to vector<16x128xf32>
    %21 = arith.addf %19, %20 : vector<16x128xf32>
    %c0_17 = arith.constant 0 : index
    %c0_18 = arith.constant 0 : index
    %22 = vector.load %arg8[%c0_17, %c0_18] : memref<16x128xf32, #tpu.memory_space<vmem>>, vector<16x128xf32>
    tpu.vector_store %arg8[%c0_17, %c0_18], %21 {strides = array<i32>} : memref<16x128xf32, #tpu.memory_space<vmem>>, vector<16x128xf32>,
    return
  }
  func.func @transform_0(%arg0: i32) -> (i32, i32) {
    %c0_i32 = arith.constant 0 : i32
    %c0_i32_0 = arith.constant 0 : i32
    return %arg0, %c0_i32 : i32, i32
  }
  func.func @transform_1(%arg0: i32) -> (i32, i32) {
    %c0_i32 = arith.constant 0 : i32
    %c0_i32_0 = arith.constant 0 : i32
    %c0_i32_1 = arith.constant 0 : i32
    return %c0_i32, %c0_i32_0 : i32, i32
  }
  func.func @transform_2(%arg0: i32) -> (i32, i32) {
    %c0_i32 = arith.constant 0 : i32
    %c0_i32_0 = arith.constant 0 : i32
    %c0_i32_1 = arith.constant 0 : i32
    return %c0_i32, %c0_i32_0 : i32, i32
  }
  func.func @transform_3(%arg0: i32) -> (i32, i32) {
    %c0_i32 = arith.constant 0 : i32
    %c0_i32_0 = arith.constant 0 : i32
    %c0_i32_1 = arith.constant 0 : i32
    return %c0_i32, %c0_i32_0 : i32, i32
  }
  func.func @transform_4(%arg0: i32) -> (i32, i32) {
    %c0_i32 = arith.constant 0 : i32
    %c0_i32_0 = arith.constant 0 : i32
    %c0_i32_1 = arith.constant 0 : i32
    return %c0_i32, %c0_i32_0 : i32, i32
  }
  func.func @transform_5(%arg0: i32) -> (i32, i32) {
    %c0_i32 = arith.constant 0 : i32
    %c0_i32_0 = arith.constant 0 : i32
    %c0_i32_1 = arith.constant 0 : i32
    return %c0_i32, %c0_i32_0 : i32, i32
  }
  func.func @transform_6(%arg0: i32) -> (i32, i32) {
    %c0_i32 = arith.constant 0 : i32
    %c0_i32_0 = arith.constant 0 : i32
    %c0_i32_1 = arith.constant 0 : i32
    return %c0_i32, %c0_i32_0 : i32, i32
  }
  func.func @transform_7(%arg0: i32) -> (i32, i32) {
    %c0_i32 = arith.constant 0 : i32
    %c0_i32_0 = arith.constant 0 : i32
    return %arg0, %c0_i32 : i32, i32
  }
}

</mosaic_0001>

<bundles_post_ra>
// kernel: tpu_custom_call.1
= control target key start
LH: loop header
LB: loop body
LE: loop exit
PB: predicated region body
PF: predicated region fallthrough
CT: control target
= control target key end

     0   :  { %12 = vsyncpa [#allocation3], 0  ;;  %s711_s0 = inlined_call_operand.hbm [shape: bf16[16,128], index: 0, kind: input, shape index: {}]   ;;  %s712_s1 = inlined_call_operand.hbm [shape: bf16[128,128], index: 1, kind: input, shape index: {}]   ;;  %s713_s2 = inlined_call_operand.vmem [shape: f32[1,128], index: 2, kind: input, shape index: {}]   ;;  %s714_s3 = inlined_call_operand.hbm [shape: bf16[128,128], index: 3, kind: input, shape index: {}]   ;;  %s715_s4 = inlined_call_operand.vmem [shape: f32[1,128], index: 4, kind: input, shape index: {}]   ;;  %s716_s5 = inlined_call_operand.hbm [shape: bf16[128,128], index: 5, kind: input, shape index: {}]   ;;  %s717_s6 = inlined_call_operand.vmem [shape: f32[1,128], index: 6, kind: input, shape index: {}]   ;;  %s718_s7 = inlined_call_operand.hbm [shape: f32[16,128], index: 7, kind: output, shape index: {}]  }
   0x1   :  { %13 = vsyncpa [#allocation6], 0 }
   0x2   :  { %14 = vsyncpa [#allocation9], 0 }
   0x3   :  { %15 = vsyncpa [#allocation4], 0  ;;  %s33_s26 = sshll.u32 %s712_s1, 4  ;;  %s638_s27 = smov [#allocation5]   ;;  %s34_s26 = int_to_ptr.hbm [resolvable:$true] %s33_s26 }
   0x4   :  { %s35_s28 = sshll.u32 %s638_s27, 4  ;;  %s20_s8 = sshll.u32 %s711_s0, 4  ;;  %s36_s28 = int_to_ptr.vmem [resolvable:$true] %s35_s28  ;;  %s21_s8 = int_to_ptr.hbm [resolvable:$true] %s20_s8 }
   0x5   :  { %s639_s9 = smov 64   ;;  %s640_s10 = smov 4  }
   0x6   :  { %41 = dma.hbm_to_vmem [thread:$0]  %s34_s26, 1024, %s36_s28, [#allocation6], %s639_s9, %s639_s9, %s640_s10  }
   0x7   :  { %s641_s11 = smov [#allocation2]   ;;  %s48_s15 = sshll.u32 %s714_s3, 4  ;;  %s49_s15 = int_to_ptr.hbm [resolvable:$true] %s48_s15 }
   0x8   :  { %s22_s12 = sshll.u32 %s641_s11, 4  ;;  %s63_s17 = sshll.u32 %s716_s5, 4  ;;  %s23_s12 = int_to_ptr.vmem [resolvable:$true] %s22_s12  ;;  %s64_s17 = int_to_ptr.hbm [resolvable:$true] %s63_s17 }
   0x9   :  { %28 = dma.hbm_to_vmem [thread:$0]  %s21_s8, 128, %s23_s12, [#allocation3], %s639_s9, %s639_s9, %s640_s10  }
   0xa   :  { %s642_s18 = smov [#allocation7]   ;;  %s643_s0 = smov [#allocation8]  }
   0xb   :  { %s50_s19 = sshll.u32 %s642_s18, 4  ;;  %s65_s20 = sshll.u32 %s643_s0, 4  ;;  %s51_s19 = int_to_ptr.vmem [resolvable:$true] %s50_s19  ;;  %s66_s20 = int_to_ptr.vmem [resolvable:$true] %s65_s20 }
   0xc   :  { %56 = dma.hbm_to_vmem [thread:$0]  %s49_s15, 1024, %s51_s19, [#allocation6], %s639_s9, %s639_s9, %s640_s10  }
   0xd   :  { %71 = dma.hbm_to_vmem [thread:$0]  %s64_s17, 1024, %s66_s20, [#allocation9], %s639_s9, %s639_s9, %s640_s10  }
   0xe   :  { %630 = dma.done.wait [#allocation3], 128  }
   0xf   :  { %631 = vsyncadd [#allocation3], 4294967168 }
  0x10   :  { %632 = dma.done.wait [#allocation6], 2048  }
  0x11   :  { %633 = vsyncadd [#allocation6], 4294965248 }
  0x12   :  { %634 = dma.done.wait [#allocation9], 1024  }
  0x13   :  { %635 = vsyncadd [#allocation9], 4294966272  ;;  %v481_v0 = vld [vmem:[#allocation5 + $0x38] sm:$0xff]  ;;  %v480_v1 = vld [vmem:[#allocation5 + $0x30] sm:$0xff]  ;;  %s644_s24 = smov [#allocation10]   ;;  %s645_s28 = smov 128  }
  0x14   :  { %166 = vmatpush.bf16.msra.mxu0 %v481_v0  ;;  %v489_v2 = vld [vmem:[#allocation7 + $0x38] sm:$0xff]  ;;  %v488_v3 = vld [vmem:[#allocation7 + $0x30] sm:$0xff]  ;;  %v479_v4 = vld [vmem:[#allocation5 + $0x28] sm:$0xff]  ;;  %s356_s25 = sshll.u32 %s644_s24, 4  ;;  %s646_s29 = smov 8   ;;  %s357_s25 = int_to_ptr.vmem [resolvable:$true] %s356_s25 }
  0x15   :  { %251 = vmatpush.bf16.msra.mxu1 %v489_v2  ;;  %v487_v5 = vld [vmem:[#allocation7 + $0x28] sm:$0xff]  ;;  %v478_v6 = vld [vmem:[#allocation5 + $0x20] sm:$0xff]  ;;  %v477_v8 = vld [vmem:[#allocation5 + $0x18] sm:$0xff] }
  0x16   :  { %v486_v7 = vld [vmem:[#allocation7 + $0x20] sm:$0xff]  ;;  %v476_v9 = vld [vmem:[#allocation5 + $0x10] sm:$0xff]  ;;  %v475_v10 = vld [vmem:[#allocation5 + $0x8] sm:$0xff] }
  0x17   :  { %v474_v11 = vld [vmem:[#allocation5] sm:$0xff]  ;;  %v473_v12 = vld [vmem:[#allocation2] sm:$0xff]  ;;  %v484_v14 = vld [vmem:[#allocation7 + $0x10] sm:$0xff] }
  0x18   :  { %167 = vmatpush.bf16.msra.mxu0 %v480_v1  ;;  %v485_v13 = vld [vmem:[#allocation7 + $0x18] sm:$0xff]  ;;  %v483_v15 = vld [vmem:[#allocation7 + $0x8] sm:$0xff]  ;;  %v482_v16 = vld [vmem:[#allocation7] sm:$0xff] }
  0x19   :  { %252 = vmatpush.bf16.msra.mxu1 %v488_v3  ;;  %v497_v17 = vld [vmem:[#allocation8 + $0x38] sm:$0xff]  ;;  %v496_v18 = vld [vmem:[#allocation8 + $0x30] sm:$0xff]  ;;  %v495_v19 = vld [vmem:[#allocation8 + $0x28] sm:$0xff] }
  0x1a   :  { %336 = vmatpush.bf16.msra.mxu2 %v497_v17  ;;  %v494_v20 = vld [vmem:[#allocation8 + $0x20] sm:$0xff]  ;;  %v507_v22 = vld [vmem:[%s713_s2] ss:$0 sm:$0xff]  ;;  %v492_v30 = vld [vmem:[#allocation8 + $0x10] sm:$0xff] }
  0x1b   :  { %v493_v29 = vld [vmem:[#allocation8 + $0x18] sm:$0xff]  ;;  %v491_v31 = vld [vmem:[#allocation8 + $0x8] sm:$0xff]  ;;  %v490_v32 = vld [vmem:[#allocation8] sm:$0xff] }
  0x1c   :  { %168 = vmatpush.bf16.msra.mxu0 %v479_v4  ;;  %v508_v34 = vld [vmem:[%s715_s4] ss:$0 sm:$0xff]  ;;  %s358_s4 = sshll.u32 %s718_s7, 4  ;;  %s359_s4 = int_to_ptr.hbm [resolvable:$true] %s358_s4 }
  0x1d   :  { %253 = vmatpush.bf16.msra.mxu1 %v487_v5  ;;  %v509_v41 = vld [vmem:[%s717_s6] ss:$0 sm:$0xff] }
  0x1e   :  { %337 = vmatpush.bf16.msra.mxu2 %v496_v18 }
  0x20   :  { %169 = vmatpush.bf16.msra.mxu0 %v478_v6 }
  0x21   :  { %254 = vmatpush.bf16.msra.mxu1 %v486_v7 }
  0x22   :  { %338 = vmatpush.bf16.msra.mxu2 %v495_v19 }
  0x24   :  { %170 = vmatpush.bf16.msra.mxu0 %v477_v8 }
  0x25   :  { %255 = vmatpush.bf16.msra.mxu1 %v485_v13 }
  0x26   :  { %339 = vmatpush.bf16.msra.mxu2 %v494_v20 }
  0x28   :  { %171 = vmatpush.bf16.msra.mxu0 %v476_v9 }
  0x29   :  { %256 = vmatpush.bf16.msra.mxu1 %v484_v14 }
  0x2a   :  { %340 = vmatpush.bf16.msra.mxu2 %v493_v29 }
  0x2c   :  { %172 = vmatpush.bf16.msra.mxu0 %v475_v10 }
  0x2d   :  { %257 = vmatpush.bf16.msra.mxu1 %v483_v15 }
  0x2e   :  { %341 = vmatpush.bf16.msra.mxu2 %v492_v30 }
  0x30   :  { %173 = vmatpush.bf16.msra.mxu0 %v474_v11 }
  0x31   :  { %258 = vmatpush.bf16.msra.mxu1 %v482_v16 }
  0x32   :  { %342 = vmatpush.bf16.msra.mxu2 %v491_v31 }
  0x33   :  { %174 = vmatmul.bf16.vlgmr.msra.gmra.mxu0 %v473_v12 }
  0x36   :  { %343 = vmatpush.bf16.msra.mxu2 %v490_v32 }
  0xb0   :  { %v175_v21 = vpop.f32.mrf.mxu0 }
  0xb1   :  { %v176_v23 = vadd.f32 %v507_v22, %v175_v21 }
  0xb3   :  { %v180_v26 = vmax.f32 %v176_v23, 0.0 }
  0xb8   :  { %v177_v24 = vpop.f32.mrf.mxu0 }
  0xb9   :  { %v178_v25 = vadd.f32 %v507_v22, %v177_v24 }
  0xbb   :  { %v181_v27 = vmax.f32 %v178_v25, 0.0 }
  0xbd   :  { %v182_v28 = vpack.c.bf16 %v181_v27, %v180_v26 }
  0xbf   :  { %259 = vmatmul.bf16.vlgmr.msra.gmra.mxu1 %v182_v28 }
 0x13c   :  { %v260_v33 = vpop.f32.mrf.mxu1 }
 0x13d   :  { %v261_v35 = vadd.f32 %v508_v34, %v260_v33 }
 0x13f   :  { %v265_v38 = vmax.f32 %v261_v35, 0.0 }
 0x144   :  { %v262_v36 = vpop.f32.mrf.mxu1 }
 0x145   :  { %v263_v37 = vadd.f32 %v508_v34, %v262_v36 }
 0x147   :  { %v266_v39 = vmax.f32 %v263_v37, 0.0 }
 0x149   :  { %v267_v40 = vpack.c.bf16 %v266_v39, %v265_v38 }
 0x14b   :  { %344 = vmatmul.bf16.vlgmr.msra.gmra.mxu2 %v267_v40 }
 0x1ce   :  { %v345_v42 = vpop.f32.mrf.mxu2 }
 0x1cf   :  { %v346_v43 = vadd.f32 %v509_v41, %v345_v42 }
 0x1d1   :  { %350 = vst [vmem:[#allocation10] sm:$0xff] %v346_v43 }
 0x1d6   :  { %v347_v44 = vpop.f32.mrf.mxu2 }
 0x1d7   :  { %v348_v45 = vadd.f32 %v509_v41, %v347_v44 }
 0x1d9   :  { %351 = vst [vmem:[#allocation10 + $0x8] sm:$0xff] %v348_v45 }
 0x1da   :  { %364 = dma.vmem_to_hbm [thread:$0]  %s357_s25, 256, %s359_s4, [#allocation4], %s645_s28, %s645_s28, %s646_s29  }
 0x1db   :  { %636 = dma.done.wait [#allocation4], 256  }
 0x1dc   :  { %637 = vsyncadd [#allocation4], 4294967040 }
 0x1dd   :  { %369 = vsyncpa [#allocation3], 1 }
 0x1de   :  { %370 = vsyncpa [#allocation6], 1 }
 0x1df   :  { %371 = vsyncpa [#allocation9], 1 }
 0x1e0   :  { %372 = vsyncpa [#allocation4], 1 }

</bundles_post_ra>
